<compile_context>
chip_gen: v5e
topology: v5e:2x2
jax: 0.10.0
libtpu: 0.0.40
codegen_flags: <defaults>
</compile_context>

<pallas_src>
import jax
import jax.numpy as jnp
from jax import lax
from jax.experimental import pallas as pl
from jax.experimental.pallas import tpu as pltpu


def _round_up(x, m):
    return ((x + m - 1) // m) * m


def _vmem_budget_bytes():
    """Per-core VMEM capacity (v5e/v6e: 128 MiB, v7x: 64 MiB)."""
    try:
        return int(pltpu.get_tpu_info().vmem_capacity_bytes)
    except Exception:
        return 64 * 1024 * 1024   # conservative: v7x per-TensorCore VMEM


def _step_vmem_bytes(tb, cb, n_pad, F, A):
    """Rough per-grid-step VMEM footprint."""
    feat = 2 * tb * n_pad * F * 2            # bf16 feature block, double-buffered
    att2 = 2 * tb * A * 4                    # f32 att2 block, double-buffered
    outs = 2 * (tb * F * 4 + tb * n_pad * 4)  # context + alpha, double-buffered
    consts = F * A * 2 + A * 4               # single-buffered Wf / w_full row
    work = cb * n_pad * (2 * A + F) * 4      # att1/att chunk + f32 feature chunk
    return feat + att2 + outs + consts + work


def _pick_tiles(B, n_pad, F, A, vmem_budget):
    """Return (tb, cb): per-grid-step batch tile and in-kernel batch chunk."""
    # In-kernel chunk: >= 256 fused matmul rows (fills the MXU M dim on v5e,
    # half a v6e/v7x tile); batch chunk kept a multiple of 8 so the (tb, ...)
    # 2-D blocks tile cleanly on sublanes.
    cb = max(8, _round_up(pl.cdiv(256, n_pad), 8))
    if cb >= B:
        return B, B
    # Grid tile: a few chunks per step (target ~512 fused rows) to amortize
    # the ~0.35us per-step overhead, capped so the per-step footprint stays
    # well inside the scoped-VMEM budget (64 MiB physical per TC on v7x).
    k = max(1, pl.cdiv(512, cb * n_pad))
    while k > 1 and _step_vmem_bytes(k * cb, cb, n_pad, F, A) > 0.6 * vmem_budget:
        k -= 1
    tb = min(k * cb, _round_up(B, cb))
    return tb, cb


def _make_kernel(n_valid, cb):
    """Kernel over one (TB, Npad, F) feature block; each inner-loop step
    handles CB batch rows (CB * Npad fused matmul rows)."""

    def kernel(feat_ref, att2_ref, wf_ref, wfull_ref, ctx_ref, alpha_ref):
        tb, n_pad, f = feat_ref.shape
        a = wf_ref.shape[1]
        n_chunks = tb // cb

        wf = wf_ref[...]                              # (F, A) bf16, resident
        wfull = wfull_ref[...].reshape(1, 1, a)       # (1, 1, A) f32

        def chunk(c, carry):
            r0 = pl.multiple_of(c * cb, cb)
            feat = feat_ref[pl.ds(r0, cb)]            # (CB, Npad, F) bf16
            att2 = att2_ref[pl.ds(r0, cb)]            # (CB, A)       f32

            # att1 = features @ Wf : CB*Npad rows fused into the MXU M dim.
            # Npad % 8 == 0 makes both reshapes layout-free (no relayout copy).
            att1 = jnp.dot(feat.reshape(cb * n_pad, f), wf,
                           preferred_element_type=jnp.float32)        # f32
            att = jnp.maximum(att1.reshape(cb, n_pad, a)
                              + att2[:, None, :], 0.0)                # (CB,Npad,A)

            # e = full_att(att): width-1 projection as a VPU mul + lane reduce
            # (keeps the MXU free). full_att's bias is softmax-invariant.
            e = jnp.sum(att * wfull, axis=-1)                         # (CB, Npad)
            if n_pad != n_valid:
                lane = lax.broadcasted_iota(jnp.int32, (1, n_pad), 1)
                e = jnp.where(lane < n_valid, e, jnp.float32(-1e30))

            # softmax over regions (Npad sits on lanes -> lane reduces).
            m = jnp.max(e, axis=-1, keepdims=True)
            p = jnp.exp(e - m)
            denom = jnp.sum(p, axis=-1, keepdims=True)
            alpha = p * pl.reciprocal(denom, approx=True)             # EUP recip

            # context = sum_n alpha * features (VPU mul + sublane reduce), f32.
            ctx = jnp.sum(feat.astype(jnp.float32) * alpha[:, :, None], axis=1)

            ctx_ref[pl.ds(r0, cb)] = ctx.astype(ctx_ref.dtype)
            alpha_ref[pl.ds(r0, cb)] = alpha.astype(alpha_ref.dtype)
            return carry

        lax.fori_loop(0, n_chunks, chunk, 0, unroll=True)

    return kernel


def updown_attention(features, hidden, params, *, block_b=None, chunk_b=None,
                     feature_buffers=None):
    """features: (B, N, F), hidden: (B, H).
    params: wf (F, A), bf (A,), wh (H, A), bh (A,), wfull (A, 1), bfull (1,)
    (Linear weights pre-transposed to (in, out)).
    Returns (context (B, F) f32, alpha (B, N) f32).

    Note: params["bfull"] is intentionally unused — softmax is invariant to a
    per-row constant shift, so it cannot affect (context, alpha). Raw logits
    `e` are never exposed by this API.
    """
    B, N, F = features.shape
    A = params["wf"].shape[1]
    f32, bf16 = jnp.float32, jnp.bfloat16

    n_pad = _round_up(N, 8)

    # att2 = hidden @ Wh + (bf + bh): one full-batch XLA matmul (full MXU M)
    # instead of an underfilled M=TB matmul inside every grid step.
    att2 = (hidden.astype(f32) @ params["wh"].astype(f32)
            + (params["bf"] + params["bh"]).reshape(1, A).astype(f32))

    wf_bf16 = params["wf"].astype(bf16)                    # (F, A) MXU operand
    wfull_row = params["wfull"].reshape(1, A).astype(f32)  # (1, A)

    # bf16 feature stream (dominant HBM traffic); zero-pad N to a multiple of
    # 8 so in-kernel reshapes are layout-free (padded logits masked in-kernel).
    feat_bf16 = features.astype(bf16)
    if n_pad != N:
        feat_bf16 = jnp.pad(feat_bf16, ((0, 0), (0, n_pad - N), (0, 0)))

    budget = _vmem_budget_bytes()
    tb, cb = _pick_tiles(B, n_pad, F, A, budget)
    if block_b is not None:
        tb = block_b
        cb = chunk_b if chunk_b is not None else tb
    elif chunk_b is not None:
        cb = chunk_b
        tb = _round_up(tb, cb)
    assert tb % cb == 0, "batch tile must be a multiple of the batch chunk"

    b_pad = _round_up(B, tb)
    if b_pad != B:
        # Zero padding is safe: padded rows give a finite uniform softmax and
        # a zero context; they are sliced away below.
        feat_bf16 = jnp.pad(feat_bf16, ((0, b_pad - B), (0, 0), (0, 0)))
        att2 = jnp.pad(att2, ((0, b_pad - B), (0, 0)))

    step = _step_vmem_bytes(tb, cb, n_pad, F, A)
    vmem_limit = int(min(0.9 * budget, max(32 * 2 ** 20, 2 * step)))

    cost = pl.CostEstimate(
        flops=2 * b_pad * n_pad * A * (F + 1) + 2 * b_pad * n_pad * F,
        transcendentals=b_pad * (n_pad + 1),
        bytes_accessed=(b_pad * n_pad * F * 2 + b_pad * A * 4 + F * A * 2
                        + A * 4 + b_pad * F * 4 + b_pad * n_pad * 4),
    )

    kernel = _make_kernel(N, cb)

    def run(single_buffer_weights):
        def const_spec(shape):
            if single_buffer_weights:
                return pl.BlockSpec(shape, lambda b: (0,) * len(shape),
                                    pipeline_mode=pl.Buffered(1))
            return pl.BlockSpec(shape, lambda b: (0,) * len(shape))

        if feature_buffers is None:
            feat_spec = pl.BlockSpec((tb, n_pad, F), lambda b: (b, 0, 0))
        else:  # v7x knob: deepen the feature-stream pipeline (sweep 2 vs 3).
            feat_spec = pl.BlockSpec((tb, n_pad, F), lambda b: (b, 0, 0),
                                     pipeline_mode=pl.Buffered(feature_buffers))

        return pl.pallas_call(
            kernel,
            out_shape=(jax.ShapeDtypeStruct((b_pad, F), f32),
                       jax.ShapeDtypeStruct((b_pad, n_pad), f32)),
            grid_spec=pltpu.PrefetchScalarGridSpec(
                num_scalar_prefetch=0,
                grid=(b_pad // tb,),
                in_specs=[
                    feat_spec,                                    # features
                    pl.BlockSpec((tb, A), lambda b: (b, 0)),      # att2
                    const_spec((F, A)),                           # Wf (resident)
                    const_spec((1, A)),                           # w_full row
                ],
                out_specs=[
                    pl.BlockSpec((tb, F), lambda b: (b, 0)),      # context
                    pl.BlockSpec((tb, n_pad), lambda b: (b, 0)),  # alpha
                ],
            ),
            compiler_params=pltpu.CompilerParams(
                dimension_semantics=("parallel",),   # batch tiles shard across TCs
                vmem_limit_bytes=vmem_limit,
            ),
            cost_estimate=cost,
        )(feat_bf16, att2, wf_bf16, wfull_row)

    try:
        ctx, alpha = run(True)
    except Exception:
        # jax without BlockSpec(pipeline_mode=...) support: fall back to the
        # default double-buffered constants (correctness unaffected).
        ctx, alpha = run(False)

    return ctx[:B], alpha[:B, :N]


def _reference(features, hidden, params):
    att1 = features @ params["wf"] + params["bf"]                 # (B, N, A)
    att2 = (hidden @ params["wh"] + params["bh"])[:, None, :]     # (B, 1, A)
    att = jnp.maximum(att1 + att2, 0.0)
    e = (att @ params["wfull"])[..., 0] + params["bfull"][0]      # (B, N)
    alpha = jax.nn.softmax(e, axis=1)
    context = jnp.sum(features * alpha[:, :, None], axis=1)
    return context, alpha


if __name__ == "__main__":
    # Small shapes consistent with the module's forward. N=12 also exercises
    # the N -> Npad=16 padding + logit-masking path.
    B, N, FEAT, HID, ATT = 2, 12, 32, 32, 32

    key = jax.random.PRNGKey(0)
    k_feat, k_hid, k_wf, k_bf, k_wh, k_bh, k_wfull, k_bfull = jax.random.split(key, 8)

    features = jax.random.normal(k_feat, (B, N, FEAT), dtype=jnp.float32)
    hidden = jax.random.normal(k_hid, (B, HID), dtype=jnp.float32)

    # Deterministic parameter init (Linear weights stored pre-transposed: (in, out)).
    params = {
        "wf": 0.1 * jax.random.normal(k_wf, (FEAT, ATT), dtype=jnp.float32),
        "bf": 0.1 * jax.random.normal(k_bf, (ATT,), dtype=jnp.float32),
        "wh": 0.1 * jax.random.normal(k_wh, (HID, ATT), dtype=jnp.float32),
        "bh": 0.1 * jax.random.normal(k_bh, (ATT,), dtype=jnp.float32),
        "wfull": 0.1 * jax.random.normal(k_wfull, (ATT, 1), dtype=jnp.float32),
        "bfull": 0.1 * jax.random.normal(k_bfull, (1,), dtype=jnp.float32),
    }

    context, alpha = updown_attention(features, hidden, params)
    jax.block_until_ready((context, alpha))

    ref_ctx, ref_alpha = _reference(features, hidden, params)
    assert context.shape == (B, FEAT) and alpha.shape == (B, N)
    # bf16 feature/weight matmul + approximate reciprocal -> relaxed tolerance.
    assert jnp.allclose(context, ref_ctx, atol=2e-2, rtol=2e-2), "context mismatch"
    assert jnp.allclose(alpha, ref_alpha, atol=2e-2, rtol=2e-2), "alpha mismatch"
    # Padded-N regions must get exactly zero weight: rows still sum to ~1.
    assert jnp.allclose(alpha.sum(axis=1), 1.0, atol=5e-3), "alpha not normalized"

    print("KERNEL_OK")
</pallas_src>

<mosaic_0001>
module attributes {stable_mosaic.version = 11 : i64} {
  func.func @kernel(%arg0: i32, %arg1: memref<2x16x32xbf16, #tpu.memory_space<vmem>>, %arg2: memref<2x32xf32, #tpu.memory_space<vmem>>, %arg3: memref<32x32xbf16, #tpu.memory_space<vmem>>, %arg4: memref<1x32xf32, #tpu.memory_space<vmem>>, %arg5: memref<2x32xf32, #tpu.memory_space<vmem>>, %arg6: memref<2x16xf32, #tpu.memory_space<vmem>>) attributes {dimension_semantics = [#tpu.dimension_semantics<parallel>], iteration_bounds = array<i64: 1>, scalar_prefetch = 0 : i64, scratch_operands = 0 : i64, tpu.core_type = #tpu.core_type<tc>, window_params = [{transform_indices = @transform_0, window_bounds = array<i64: 2, 16, 32>}, {transform_indices = @transform_1, window_bounds = array<i64: 2, 32>}, {pipeline_mode = #tpu.pipeline_mode<synchronous>, transform_indices = @transform_2, window_bounds = array<i64: 32, 32>}, {pipeline_mode = #tpu.pipeline_mode<synchronous>, transform_indices = @transform_3, window_bounds = array<i64: 1, 32>}, {transform_indices = @transform_4, window_bounds = array<i64: 2, 32>}, {transform_indices = @transform_5, window_bounds = array<i64: 2, 16>}]} {
    %c0 = arith.constant 0 : index
    %c0_0 = arith.constant 0 : index
    %0 = vector.load %arg3[%c0, %c0_0] : memref<32x32xbf16, #tpu.memory_space<vmem>>, vector<32x32xbf16>
    %c0_1 = arith.constant 0 : index
    %c0_2 = arith.constant 0 : index
    %1 = vector.load %arg4[%c0_1, %c0_2] : memref<1x32xf32, #tpu.memory_space<vmem>>, vector<1x32xf32>
    %2 = vector.shape_cast %1 : vector<1x32xf32> to vector<1x1x32xf32>
    %c0_i32 = arith.constant 0 : i32
    %c2_i32 = arith.constant 2 : i32
    %3 = arith.muli %c0_i32, %c2_i32 : i32
    %4 = tpu.assume_multiple %3, 2 : i32
    %5 = arith.index_cast %4 : i32 to index
    %c0_3 = arith.constant 0 : index
    %c0_4 = arith.constant 0 : index
    %6 = vector.load %arg1[%5, %c0_3, %c0_4] : memref<2x16x32xbf16, #tpu.memory_space<vmem>>, vector<2x16x32xbf16>
    %7 = arith.index_cast %4 : i32 to index
    %c0_5 = arith.constant 0 : index
    %8 = vector.load %arg2[%7, %c0_5] : memref<2x32xf32, #tpu.memory_space<vmem>>, vector<2x32xf32>
    %9 = vector.shape_cast %6 : vector<2x16x32xbf16> to vector<32x32xbf16>
    %cst = arith.constant dense<0.000000e+00> : vector<32x32xf32>
    %10 = tpu.matmul %9, %0, %cst {dimension_numbers = #tpu.dot_dimension_numbers<[1], [0], [0], [1], [0, 0, 1, 1], [], []>} : vector<32x32xbf16>, vector<32x32xbf16>, vector<32x32xf32> -> vector<32x32xf32>
    %11 = vector.shape_cast %10 : vector<32x32xf32> to vector<2x16x32xf32>
    %12 = vector.shape_cast %8 : vector<2x32xf32> to vector<2x1x32xf32>
    %13 = vector.broadcast %12 : vector<2x1x32xf32> to vector<2x16x32xf32>
    %14 = arith.addf %11, %13 : vector<2x16x32xf32>
    %cst_6 = arith.constant 0.000000e+00 : f32
    %15 = vector.broadcast %cst_6 : f32 to vector<2x16x32xf32>
    %16 = arith.maximumf %14, %15 : vector<2x16x32xf32>
    %17 = vector.broadcast %2 : vector<1x1x32xf32> to vector<2x16x32xf32>
    %18 = arith.mulf %16, %17 : vector<2x16x32xf32>
    %cst_7 = arith.constant dense<0.000000e+00> : vector<2x16xf32>
    %19 = vector.multi_reduction <add>, %18, %cst_7 [2] : vector<2x16x32xf32> to vector<2x16xf32>
    %20 = tpu.iota {dimensions = array<i32: 1>} : vector<1x16xi32>
    %c12_i32 = arith.constant 12 : i32
    %21 = vector.broadcast %c12_i32 : i32 to vector<1x16xi32>
    %22 = arith.cmpi slt, %20, %21 : vector<1x16xi32>
    %cst_8 = arith.constant -1.000000e+30 : f32
    %23 = vector.shape_cast %22 : vector<1x16xi1> to vector<1x16xi1>
    %24 = vector.broadcast %23 : vector<1x16xi1> to vector<2x16xi1>
    %25 = vector.broadcast %cst_8 : f32 to vector<2x16xf32>
    %26 = arith.select %24, %19, %25 : vector<2x16xi1>, vector<2x16xf32>
    %cst_9 = arith.constant dense<0xFF800000> : vector<2xf32>
    %27 = vector.multi_reduction <maximumf>, %26, %cst_9 [1] : vector<2x16xf32> to vector<2xf32>
    %28 = vector.shape_cast %27 : vector<2xf32> to vector<2x1xf32>
    %29 = vector.broadcast %28 : vector<2x1xf32> to vector<2x16xf32>
    %30 = arith.subf %26, %29 : vector<2x16xf32>
    %31 = math.exp %30 : vector<2x16xf32>
    %cst_10 = arith.constant dense<0.000000e+00> : vector<2xf32>
    %32 = vector.multi_reduction <add>, %31, %cst_10 [1] : vector<2x16xf32> to vector<2xf32>
    %33 = vector.shape_cast %32 : vector<2xf32> to vector<2x1xf32>
    %34 = tpu.reciprocal %33 {approx = true} : vector<2x1xf32> -> vector<2x1xf32>
    %35 = vector.broadcast %34 : vector<2x1xf32> to vector<2x16xf32>
    %36 = arith.mulf %31, %35 : vector<2x16xf32>
    %37 = arith.extf %6 : vector<2x16x32xbf16> to vector<2x16x32xf32>
    %38 = vector.shape_cast %36 : vector<2x16xf32> to vector<2x16x1xf32>
    %39 = vector.broadcast %38 : vector<2x16x1xf32> to vector<2x16x32xf32>
    %40 = arith.mulf %37, %39 : vector<2x16x32xf32>
    %cst_11 = arith.constant dense<0.000000e+00> : vector<2x32xf32>
    %41 = vector.multi_reduction <add>, %40, %cst_11 [1] : vector<2x16x32xf32> to vector<2x32xf32>
    %42 = arith.index_cast %4 : i32 to index
    %c0_12 = arith.constant 0 : index
    %43 = vector.load %arg5[%42, %c0_12] : memref<2x32xf32, #tpu.memory_space<vmem>>, vector<2x32xf32>
    tpu.vector_store %arg5[%42, %c0_12], %41 {strides = array<i32>} : memref<2x32xf32, #tpu.memory_space<vmem>>, vector<2x32xf32>,
    %44 = arith.index_cast %4 : i32 to index
    %c0_13 = arith.constant 0 : index
    %45 = vector.load %arg6[%44, %c0_13] : memref<2x16xf32, #tpu.memory_space<vmem>>, vector<2x16xf32>
    tpu.vector_store %arg6[%44, %c0_13], %36 {strides = array<i32>} : memref<2x16xf32, #tpu.memory_space<vmem>>, vector<2x16xf32>,
    %c1_i32 = arith.constant 1 : i32
    return
  }
  func.func @transform_0(%arg0: i32) -> (i32, i32, i32) {
    %c0_i32 = arith.constant 0 : i32
    %c0_i32_0 = arith.constant 0 : i32
    %c0_i32_1 = arith.constant 0 : i32
    return %arg0, %c0_i32, %c0_i32_0 : i32, i32, i32
  }
  func.func @transform_1(%arg0: i32) -> (i32, i32) {
    %c0_i32 = arith.constant 0 : i32
    %c0_i32_0 = arith.constant 0 : i32
    return %arg0, %c0_i32 : i32, i32
  }
  func.func @transform_2(%arg0: i32) -> (i32, i32) {
    %c0_i32 = arith.constant 0 : i32
    %c0_i32_0 = arith.constant 0 : i32
    %c0_i32_1 = arith.constant 0 : i32
    return %c0_i32, %c0_i32_0 : i32, i32
  }
  func.func @transform_3(%arg0: i32) -> (i32, i32) {
    %c0_i32 = arith.constant 0 : i32
    %c0_i32_0 = arith.constant 0 : i32
    %c0_i32_1 = arith.constant 0 : i32
    return %c0_i32, %c0_i32_0 : i32, i32
  }
  func.func @transform_4(%arg0: i32) -> (i32, i32) {
    %c0_i32 = arith.constant 0 : i32
    %c0_i32_0 = arith.constant 0 : i32
    return %arg0, %c0_i32 : i32, i32
  }
  func.func @transform_5(%arg0: i32) -> (i32, i32) {
    %c0_i32 = arith.constant 0 : i32
    %c0_i32_0 = arith.constant 0 : i32
    return %arg0, %c0_i32 : i32, i32
  }
}

module attributes {stable_mosaic.version = 11 : i64} {
  func.func @kernel(%arg0: i32, %arg1: memref<2x16x32xbf16, #tpu.memory_space<vmem>>, %arg2: memref<2x32xf32, #tpu.memory_space<vmem>>, %arg3: memref<32x32xbf16, #tpu.memory_space<vmem>>, %arg4: memref<1x32xf32, #tpu.memory_space<vmem>>, %arg5: memref<2x32xf32, #tpu.memory_space<vmem>>, %arg6: memref<2x16xf32, #tpu.memory_space<vmem>>) attributes {dimension_semantics = [#tpu.dimension_semantics<parallel>], iteration_bounds = array<i64: 1>, scalar_prefetch = 0 : i64, scratch_operands = 0 : i64, tpu.core_type = #tpu.core_type<tc>, window_params = [{transform_indices = @transform_0, window_bounds = array<i64: 2, 16, 32>}, {transform_indices = @transform_1, window_bounds = array<i64: 2, 32>}, {pipeline_mode = #tpu.pipeline_mode<synchronous>, transform_indices = @transform_2, window_bounds = array<i64: 32, 32>}, {pipeline_mode = #tpu.pipeline_mode<synchronous>, transform_indices = @transform_3, window_bounds = array<i64: 1, 32>}, {transform_indices = @transform_4, window_bounds = array<i64: 2, 32>}, {transform_indices = @transform_5, window_bounds = array<i64: 2, 16>}]} {
    %c0 = arith.constant 0 : index
    %c0_0 = arith.constant 0 : index
    %0 = vector.load %arg3[%c0, %c0_0] : memref<32x32xbf16, #tpu.memory_space<vmem>>, vector<32x32xbf16>
    %c0_1 = arith.constant 0 : index
    %c0_2 = arith.constant 0 : index
    %1 = vector.load %arg4[%c0_1, %c0_2] : memref<1x32xf32, #tpu.memory_space<vmem>>, vector<1x32xf32>
    %2 = vector.shape_cast %1 : vector<1x32xf32> to vector<1x1x32xf32>
    %c0_i32 = arith.constant 0 : i32
    %c2_i32 = arith.constant 2 : i32
    %3 = arith.muli %c0_i32, %c2_i32 : i32
    %4 = tpu.assume_multiple %3, 2 : i32
    %5 = arith.index_cast %4 : i32 to index
    %c0_3 = arith.constant 0 : index
    %c0_4 = arith.constant 0 : index
    %6 = vector.load %arg1[%5, %c0_3, %c0_4] : memref<2x16x32xbf16, #tpu.memory_space<vmem>>, vector<2x16x32xbf16>
    %7 = arith.index_cast %4 : i32 to index
    %c0_5 = arith.constant 0 : index
    %8 = vector.load %arg2[%7, %c0_5] : memref<2x32xf32, #tpu.memory_space<vmem>>, vector<2x32xf32>
    %9 = vector.shape_cast %6 : vector<2x16x32xbf16> to vector<32x32xbf16>
    %cst = arith.constant dense<0.000000e+00> : vector<32x32xf32>
    %10 = tpu.matmul %9, %0, %cst {dimension_numbers = #tpu.dot_dimension_numbers<[1], [0], [0], [1], [0, 0, 1, 1], [], []>} : vector<32x32xbf16>, vector<32x32xbf16>, vector<32x32xf32> -> vector<32x32xf32>
    %11 = vector.shape_cast %10 : vector<32x32xf32> to vector<2x16x32xf32>
    %12 = vector.shape_cast %8 : vector<2x32xf32> to vector<2x1x32xf32>
    %13 = vector.broadcast %12 : vector<2x1x32xf32> to vector<2x16x32xf32>
    %14 = arith.addf %11, %13 : vector<2x16x32xf32>
    %cst_6 = arith.constant 0.000000e+00 : f32
    %15 = vector.broadcast %cst_6 : f32 to vector<2x16x32xf32>
    %16 = arith.maximumf %14, %15 : vector<2x16x32xf32>
    %17 = vector.broadcast %2 : vector<1x1x32xf32> to vector<2x16x32xf32>
    %18 = arith.mulf %16, %17 : vector<2x16x32xf32>
    %cst_7 = arith.constant dense<0.000000e+00> : vector<2x16xf32>
    %19 = vector.multi_reduction <add>, %18, %cst_7 [2] : vector<2x16x32xf32> to vector<2x16xf32>
    %20 = tpu.iota {dimensions = array<i32: 1>} : vector<1x16xi32>
    %c12_i32 = arith.constant 12 : i32
    %21 = vector.broadcast %c12_i32 : i32 to vector<1x16xi32>
    %22 = arith.cmpi slt, %20, %21 : vector<1x16xi32>
    %cst_8 = arith.constant -1.000000e+30 : f32
    %23 = vector.shape_cast %22 : vector<1x16xi1> to vector<1x16xi1>
    %24 = vector.broadcast %23 : vector<1x16xi1> to vector<2x16xi1>
    %25 = vector.broadcast %cst_8 : f32 to vector<2x16xf32>
    %26 = arith.select %24, %19, %25 : vector<2x16xi1>, vector<2x16xf32>
    %cst_9 = arith.constant dense<0xFF800000> : vector<2xf32>
    %27 = vector.multi_reduction <maximumf>, %26, %cst_9 [1] : vector<2x16xf32> to vector<2xf32>
    %28 = vector.shape_cast %27 : vector<2xf32> to vector<2x1xf32>
    %29 = vector.broadcast %28 : vector<2x1xf32> to vector<2x16xf32>
    %30 = arith.subf %26, %29 : vector<2x16xf32>
    %31 = math.exp %30 : vector<2x16xf32>
    %cst_10 = arith.constant dense<0.000000e+00> : vector<2xf32>
    %32 = vector.multi_reduction <add>, %31, %cst_10 [1] : vector<2x16xf32> to vector<2xf32>
    %33 = vector.shape_cast %32 : vector<2xf32> to vector<2x1xf32>
    %34 = tpu.reciprocal %33 {approx = true} : vector<2x1xf32> -> vector<2x1xf32>
    %35 = vector.broadcast %34 : vector<2x1xf32> to vector<2x16xf32>
    %36 = arith.mulf %31, %35 : vector<2x16xf32>
    %37 = arith.extf %6 : vector<2x16x32xbf16> to vector<2x16x32xf32>
    %38 = vector.shape_cast %36 : vector<2x16xf32> to vector<2x16x1xf32>
    %39 = vector.broadcast %38 : vector<2x16x1xf32> to vector<2x16x32xf32>
    %40 = arith.mulf %37, %39 : vector<2x16x32xf32>
    %cst_11 = arith.constant dense<0.000000e+00> : vector<2x32xf32>
    %41 = vector.multi_reduction <add>, %40, %cst_11 [1] : vector<2x16x32xf32> to vector<2x32xf32>
    %42 = arith.index_cast %4 : i32 to index
    %c0_12 = arith.constant 0 : index
    %43 = vector.load %arg5[%42, %c0_12] : memref<2x32xf32, #tpu.memory_space<vmem>>, vector<2x32xf32>
    tpu.vector_store %arg5[%42, %c0_12], %41 {strides = array<i32>} : memref<2x32xf32, #tpu.memory_space<vmem>>, vector<2x32xf32>,
    %44 = arith.index_cast %4 : i32 to index
    %c0_13 = arith.constant 0 : index
    %45 = vector.load %arg6[%44, %c0_13] : memref<2x16xf32, #tpu.memory_space<vmem>>, vector<2x16xf32>
    tpu.vector_store %arg6[%44, %c0_13], %36 {strides = array<i32>} : memref<2x16xf32, #tpu.memory_space<vmem>>, vector<2x16xf32>,
    %c1_i32 = arith.constant 1 : i32
    return
  }
  func.func @transform_0(%arg0: i32) -> (i32, i32, i32) {
    %c0_i32 = arith.constant 0 : i32
    %c0_i32_0 = arith.constant 0 : i32
    %c0_i32_1 = arith.constant 0 : i32
    return %arg0, %c0_i32, %c0_i32_0 : i32, i32, i32
  }
  func.func @transform_1(%arg0: i32) -> (i32, i32) {
    %c0_i32 = arith.constant 0 : i32
    %c0_i32_0 = arith.constant 0 : i32
    return %arg0, %c0_i32 : i32, i32
  }
  func.func @transform_2(%arg0: i32) -> (i32, i32) {
    %c0_i32 = arith.constant 0 : i32
    %c0_i32_0 = arith.constant 0 : i32
    %c0_i32_1 = arith.constant 0 : i32
    return %c0_i32, %c0_i32_0 : i32, i32
  }
  func.func @transform_3(%arg0: i32) -> (i32, i32) {
    %c0_i32 = arith.constant 0 : i32
    %c0_i32_0 = arith.constant 0 : i32
    %c0_i32_1 = arith.constant 0 : i32
    return %c0_i32, %c0_i32_0 : i32, i32
  }
  func.func @transform_4(%arg0: i32) -> (i32, i32) {
    %c0_i32 = arith.constant 0 : i32
    %c0_i32_0 = arith.constant 0 : i32
    return %arg0, %c0_i32 : i32, i32
  }
  func.func @transform_5(%arg0: i32) -> (i32, i32) {
    %c0_i32 = arith.constant 0 : i32
    %c0_i32_0 = arith.constant 0 : i32
    return %arg0, %c0_i32 : i32, i32
  }
}

</mosaic_0001>

<bundles_post_ra>
// kernel: tpu_custom_call.1
= control target key start
LH: loop header
LB: loop body
LE: loop exit
PB: predicated region body
PF: predicated region fallthrough
CT: control target
= control target key end

     0   :  { %11 = vsyncpa [#allocation3], 0  ;;  %s526_s0 = inlined_call_operand.hbm [shape: bf16[2,16,32], index: 0, kind: input, shape index: {}]   ;;  %s527_s1 = inlined_call_operand.hbm [shape: f32[2,32], index: 1, kind: input, shape index: {}]   ;;  %s528_s2 = inlined_call_operand.hbm [shape: bf16[32,32], index: 2, kind: input, shape index: {}]   ;;  %s529_s3 = inlined_call_operand.vmem [shape: f32[1,32], index: 3, kind: input, shape index: {}]   ;;  %s530_s4 = inlined_call_operand.hbm [shape: f32[2,32], index: 4, kind: output, shape index: {0}]   ;;  %s531_s5 = inlined_call_operand.hbm [shape: f32[2,16], index: 5, kind: output, shape index: {1}]  }
   0x1   :  { %12 = vsyncpa [#allocation6], 0 }
   0x2   :  { %13 = vsyncpa [#allocation4], 0  ;;  %s33_s20 = sshll.u32 %s527_s1, 4  ;;  %s34_s20 = int_to_ptr.hbm [resolvable:$true] %s33_s20 }
   0x3   :  { %14 = vsyncpa [#allocation10], 0  ;;  %s456_s21 = smov [#allocation5]   ;;  %s19_s25 = sshll.u32 %s526_s0, 4  ;;  %s20_s25 = int_to_ptr.hbm [resolvable:$true] %s19_s25 }
   0x4   :  { %s35_s22 = sshll.u32 %s456_s21, 4  ;;  %s457_s26 = smov [#allocation2]   ;;  %s36_s22 = int_to_ptr.vmem [resolvable:$true] %s35_s22 }
   0x5   :  { %38 = dma.hbm_to_vmem [thread:$0]  %s34_s20, 32, %s36_s22, [#allocation6]  }
   0x6   :  { %s21_s27 = sshll.u32 %s457_s26, 4  ;;  %s458_s28 = smov 64   ;;  %s22_s27 = int_to_ptr.vmem [resolvable:$true] %s21_s27 }
   0x7   :  { %s459_s29 = smov 4   ;;  %s43_s1 = sshll.u32 %s528_s2, 4  ;;  %s44_s1 = int_to_ptr.hbm [resolvable:$true] %s43_s1 }
   0x8   :  { %27 = dma.hbm_to_vmem [thread:$0]  %s20_s25, 256, %s22_s27, [#allocation3], %s458_s28, %s458_s28, %s459_s29  }
   0x9   :  { %s460_s7 = smov [#allocation7]  }
   0xa   :  { %s45_s8 = sshll.u32 %s460_s7, 4  ;;  %s46_s8 = int_to_ptr.vmem [resolvable:$true] %s45_s8 }
   0xb   :  { %51 = dma.hbm_to_vmem [thread:$0]  %s44_s1, 256, %s46_s8, [#allocation6], %s458_s28, %s458_s28, %s459_s29  }
   0xc   :  { %448 = dma.done.wait [#allocation3], 256  }
   0xd   :  { %449 = vsyncadd [#allocation3], 4294967040 }
   0xe   :  { %450 = dma.done.wait [#allocation6], 288  }
   0xf   :  { %451 = vsyncadd [#allocation6], 4294967008  ;;  %v306_v0 = vld [vmem:[#allocation7 + $0x8] sm:$0xff]  ;;  %v305_v1 = vld [vmem:[#allocation7] sm:$0xff]  ;;  %vm102_vm0 = vcmask 261120   ;;  %v161_v29 = vlaneseq  ;;  %vm173_vm1 = vcmask 130112  }
  0x10   :  { %115 = vmatpush.bf16.msra.mxu0 %v306_v0  ;;  %309 = vmatpush.bf16.msra.mxu1 %v306_v0  ;;  %v307_v2 = vld [vmem:[#allocation2] sm:$0xff]  ;;  %v308_v3 = vld [vmem:[#allocation2 + $0x8] sm:$0xff]  ;;  %v79_v4 = vld [vmem:[#allocation5] sm:$0x3]  ;;  %vm178_vm2 = vcmask 1041409   ;;  %vm182_vm4 = vcmask 123904  }
  0x11   :  { %v129_v5 = vrot.slane %v79_v4, 1  ;;  %v130_v6 = vperm.slane %v79_v4, 0  ;;  %v323_v12 = vld [vmem:[%s529_s3] ss:$0 sm:$0xff]  ;;  %v162_v32 = vand.u32 127, %v161_v29  ;;  %v200_v50 = vshrl.u32 %v161_v29, 7 }
  0x12   :  { %s271_s10 = sshll.u32 %s531_s5, 4  ;;  %s461_s11 = smov [#allocation9]   ;;  %v77_v57 = vld [vmem:[#allocation2 + $0x8] sm:$0xff]   ;;  %v76_v0 = vld [vmem:[#allocation2] sm:$0xff]   ;;  %vm250_vm5 = vcmask 254976   ;;  %s272_s10 = int_to_ptr.hbm [resolvable:$true] %s271_s10 }
  0x13   :  { %v131_v7 = vperm.slane %v129_v5, 0  ;;  %v171_v33 = vadd.s32 4294967288, %v162_v32  ;;  %vm163_vm3 = vcmp.lt.s32.totalorder %v162_v32, 12  ;;  %320 = vset.pattern.permute.xlu2 %v200_v50  ;;  %318 = vset.pattern.permute.xlu0 %v200_v50  ;;  %v207_v51 = vadd.s32 8, %v200_v50  ;;  %s269_s12 = sshll.u32 %s461_s11, 4  ;;  %s462_s5 = smov [#allocation8]   ;;  %s270_s12 = int_to_ptr.vmem [resolvable:$true] %s269_s12 }
  0x14   :  { %116 = vmatpush.bf16.msra.mxu0 %v305_v1  ;;  %310 = vmatpush.bf16.msra.mxu1 %v305_v1  ;;  %v196_v59 = vunpack.c.l.bf16 %v77_v57  ;;  %v197_v60 = vunpack.c.h.bf16 %v77_v57  ;;  %v195_v4 = vunpack.c.h.bf16 %v76_v0  ;;  %s258_s13 = sshll.u32 %s462_s5, 4  ;;  %s260_s16 = sshll.u32 %s530_s4, 4  ;;  %s259_s13 = int_to_ptr.vmem [resolvable:$true] %s258_s13  ;;  %s261_s16 = int_to_ptr.hbm [resolvable:$true] %s260_s16 }
  0x15   :  { %319 = vset.pattern.permute.xlu1 %v207_v51 }
  0x17   :  { %303 = vmatmul.msk.bf16.vlgmr.msra.gmra.mxu0 %vm102_vm0, %v307_v2  ;;  %304 = vmatmul.msk.bf16.vlgmr.msra.gmra.mxu1 %vm102_vm0, %v308_v3 }
  0x94   :  { %v118_v8 = vpop.f32.mrf.mxu0  ;;  %v123_v9 = vpop.f32.mrf.mxu1 }
  0x95   :  { %v134_v10 = vadd.f32 %v130_v6, %v118_v8  ;;  %v136_v11 = vadd.f32 %v131_v7, %v123_v9 }
  0x97   :  { %v138_v13 = vmax.f32 %v134_v10, 0.0  ;;  %v140_v14 = vmax.f32 %v136_v11, 0.0 }
  0x99   :  { %v147_v15 = vmul.f32 %v323_v12, %v140_v14  ;;  %v145_v16 = vmul.f32 %v323_v12, %v138_v13 }
  0x9b   :  { %v155_v17 = vsel %vm102_vm0, %v147_v15, 0.0  ;;  %v149_v18 = vsel %vm102_vm0, %v145_v16, 0.0 }
  0x9c   :  { %156 = vadd.xlane.f32.xlu1 %v155_v17  ;;  %v125_v19 = vpop.f32.mrf.mxu1  ;;  %150 = vadd.xlane.f32.xlu0 %v149_v18  ;;  %v120_v20 = vpop.f32.mrf.mxu0 }
  0x9d   :  { %v137_v21 = vadd.f32 %v131_v7, %v125_v19  ;;  %v135_v22 = vadd.f32 %v130_v6, %v120_v20  ;;  %v194_v6 = vunpack.c.l.bf16 %v76_v0 }
  0x9f   :  { %v141_v23 = vmax.f32 %v137_v21, 0.0  ;;  %v139_v24 = vmax.f32 %v135_v22, 0.0 }
  0xa1   :  { %v148_v25 = vmul.f32 %v323_v12, %v141_v23  ;;  %v146_v26 = vmul.f32 %v323_v12, %v139_v24 }
  0xa3   :  { %v158_v27 = vsel %vm102_vm0, %v148_v25, 0.0  ;;  %v152_v28 = vsel %vm102_vm0, %v146_v26, 0.0 }
  0xa4   :  { %159 = vadd.xlane.f32.xlu1 %v158_v27  ;;  %153 = vadd.xlane.f32.xlu0 %v152_v28 }
 0x10f   :  { %v157_v30 = vpop.xlane.xlu1 %156  ;;  %v151_v31 = vpop.xlane.xlu0 %150 }
 0x110   :  { %v175_v36 = vperm.slane %v157_v30, %v162_v32  ;;  %v170_v37 = vperm.slane %v151_v31, %v162_v32 }
 0x117   :  { %v160_v34 = vpop.xlane.xlu1 %159  ;;  %v154_v35 = vpop.xlane.xlu0 %153 }
 0x118   :  { %v176_v38 = vperm.slane %v160_v34, %v171_v33  ;;  %v172_v39 = vperm.slane %v154_v35, %v171_v33 }
 0x11a   :  { %v174_v40 = vsel %vm173_vm1, %v172_v39, %v170_v37  ;;  %v177_v41 = vsel %vm173_vm1, %v176_v38, %v175_v36 }
 0x11b   :  { %v179_v42 = vsel %vm178_vm2, %v177_v41, %v174_v40 }
 0x11c   :  { %v181_v43 = vsel %vm163_vm3, %v179_v42, -1e+30 }
 0x11d   :  { %v183_v44 = vsel %vm182_vm4, %v181_v43, -inf }
 0x11e   :  { %184 = vmax.xlane.f32.xlu2 %v183_v44 }
 0x191   :  { %v185_v45 = vpop.xlane.xlu2 %184 }
 0x192   :  { %v186_v46 = vsub.f32 %v181_v43, %v185_v45 }
 0x194   :  { %v187_v47 = vmul.f32 1.442695, %v186_v46 }
 0x196   :  { %324 = vpow2.f32 %v187_v47 }
 0x19c   :  { %v325_v48 = vpop.eup %324 }
 0x19d   :  { %v189_v49 = vsel %vm182_vm4, %v325_v48, 0.0 }
 0x19e   :  { %190 = vadd.xlane.f32.xlu2 %v189_v49 }
 0x211   :  { %v191_v52 = vpop.xlane.xlu2 %190 }
 0x212   :  { %326 = vrcp.f32 %v191_v52 }
 0x218   :  { %v327_v53 = vpop.eup %326 }
 0x219   :  { %v193_v54 = vmul.f32 %v327_v53, %v325_v48 }
 0x21b   :  { %252 = vst.msk [vmem:[#allocation9] sm:$0x3] %vm182_vm4, %v193_v54  ;;  %v211_v55 = vperm.slane %v193_v54, 1  ;;  %v198_v56 = vperm.slane %v193_v54, 0 }
 0x21c   :  { %274 = dma.vmem_to_hbm [thread:$0]  %s270_s12, 32, %s272_s10, [#allocation10]  }
 0x21d   :  { %216 = vperm.xlu2 %320, %v211_v55   ;;  %209 = vperm.xlu1 %319, %v198_v56  }
 0x21e   :  { %203 = vperm.xlu0 %318, %v198_v56  }
 0x225   :  { %321 = vset.pattern.permute.xlu2 %v207_v51 }
 0x226   :  { %322 = vset.pattern.permute.xlu0 %v207_v51 }
 0x22d   :  { %222 = vperm.xlu2 %321, %v211_v55  }
 0x277   :  { %v217_v58 = vpop.permute.xlu2 %216 }
 0x278   :  { %v226_v61 = vmul.f32 %v217_v58, %v196_v59 }
 0x27a   :  { %v237_v1 = vsel %vm102_vm0, %v226_v61, 0.0 }
 0x287   :  { %v223_v62 = vpop.permute.xlu2 %222 }
 0x288   :  { %v227_v63 = vmul.f32 %v223_v62, %v197_v60 }
 0x28a   :  { %v238_v2 = vsel %vm102_vm0, %v227_v63, 0.0 }
 0x28b   :  { %v239_v3 = vadd.f32 %v238_v2, %v237_v1 }
 0x28d   :  { %v240_v5 = vrot.slane %v239_v3, 4 }
 0x28f   :  { %v210_v7 = vpop.permute.xlu1 %209  ;;  %v241_v8 = vadd.f32 %v240_v5, %v239_v3 }
 0x290   :  { %v225_v9 = vmul.f32 %v210_v7, %v195_v4  ;;  %v204_v10 = vpop.permute.xlu0 %203 }
 0x291   :  { %v224_v11 = vmul.f32 %v204_v10, %v194_v6  ;;  %v242_v14 = vrot.slane %v241_v8, 2 }
 0x292   :  { %v229_v12 = vsel %vm102_vm0, %v225_v9, 0.0 }
 0x293   :  { %v228_v13 = vsel %vm102_vm0, %v224_v11, 0.0  ;;  %v243_v17 = vadd.f32 %v242_v14, %v241_v8 }
 0x294   :  { %v230_v15 = vadd.f32 %v229_v12, %v228_v13 }
 0x295   :  { %v244_v20 = vrot.slane %v243_v17, 1 }
 0x296   :  { %v231_v16 = vrot.slane %v230_v15, 4 }
 0x297   :  { %v245_v23 = vadd.f32 %v244_v20, %v243_v17 }
 0x298   :  { %v232_v18 = vadd.f32 %v231_v16, %v230_v15 }
 0x29a   :  { %v233_v19 = vrot.slane %v232_v18, 2 }
 0x29c   :  { %v234_v21 = vadd.f32 %v233_v19, %v232_v18 }
 0x29e   :  { %v235_v22 = vrot.slane %v234_v21, 1 }
 0x2a0   :  { %v236_v24 = vadd.f32 %v235_v22, %v234_v21 }
 0x2a2   :  { %v248_v25 = vsel %vm178_vm2, %v245_v23, %v236_v24 }
 0x2a3   :  { %251 = vst.msk [vmem:[#allocation8] sm:$0x3] %vm250_vm5, %v248_v25 }
 0x2a4   :  { %263 = dma.vmem_to_hbm [thread:$0]  %s259_s13, 32, %s261_s16, [#allocation4]  }
 0x2a5   :  { %452 = dma.done.wait [#allocation4], 32  }
 0x2a6   :  { %453 = vsyncadd [#allocation4], 4294967264 }
 0x2a7   :  { %454 = dma.done.wait [#allocation10], 32  }
 0x2a8   :  { %455 = vsyncadd [#allocation10], 4294967264 }
 0x2a9   :  { %283 = vsyncpa [#allocation3], 1 }
 0x2aa   :  { %284 = vsyncpa [#allocation6], 1 }
 0x2ab   :  { %285 = vsyncpa [#allocation4], 1 }
 0x2ac   :  { %286 = vsyncpa [#allocation10], 1 }

// kernel: tpu_custom_call.1
= control target key start
LH: loop header
LB: loop body
LE: loop exit
PB: predicated region body
PF: predicated region fallthrough
CT: control target
= control target key end

     0   :  { %11 = vsyncpa [#allocation3], 0  ;;  %s526_s0 = inlined_call_operand.hbm [shape: bf16[2,16,32], index: 0, kind: input, shape index: {}]   ;;  %s527_s1 = inlined_call_operand.hbm [shape: f32[2,32], index: 1, kind: input, shape index: {}]   ;;  %s528_s2 = inlined_call_operand.hbm [shape: bf16[32,32], index: 2, kind: input, shape index: {}]   ;;  %s529_s3 = inlined_call_operand.vmem [shape: f32[1,32], index: 3, kind: input, shape index: {}]   ;;  %s530_s4 = inlined_call_operand.hbm [shape: f32[2,32], index: 4, kind: output, shape index: {0}]   ;;  %s531_s5 = inlined_call_operand.hbm [shape: f32[2,16], index: 5, kind: output, shape index: {1}]  }
   0x1   :  { %12 = vsyncpa [#allocation6], 0 }
   0x2   :  { %13 = vsyncpa [#allocation4], 0  ;;  %s33_s20 = sshll.u32 %s527_s1, 4  ;;  %s34_s20 = int_to_ptr.hbm [resolvable:$true] %s33_s20 }
   0x3   :  { %14 = vsyncpa [#allocation10], 0  ;;  %s456_s21 = smov [#allocation5]   ;;  %s19_s25 = sshll.u32 %s526_s0, 4  ;;  %s20_s25 = int_to_ptr.hbm [resolvable:$true] %s19_s25 }
   0x4   :  { %s35_s22 = sshll.u32 %s456_s21, 4  ;;  %s457_s26 = smov [#allocation2]   ;;  %s36_s22 = int_to_ptr.vmem [resolvable:$true] %s35_s22 }
   0x5   :  { %38 = dma.hbm_to_vmem [thread:$0]  %s34_s20, 32, %s36_s22, [#allocation6]  }
   0x6   :  { %s21_s27 = sshll.u32 %s457_s26, 4  ;;  %s458_s28 = smov 64   ;;  %s22_s27 = int_to_ptr.vmem [resolvable:$true] %s21_s27 }
   0x7   :  { %s459_s29 = smov 4   ;;  %s43_s1 = sshll.u32 %s528_s2, 4  ;;  %s44_s1 = int_to_ptr.hbm [resolvable:$true] %s43_s1 }
   0x8   :  { %27 = dma.hbm_to_vmem [thread:$0]  %s20_s25, 256, %s22_s27, [#allocation3], %s458_s28, %s458_s28, %s459_s29  }
   0x9   :  { %s460_s7 = smov [#allocation7]  }
   0xa   :  { %s45_s8 = sshll.u32 %s460_s7, 4  ;;  %s46_s8 = int_to_ptr.vmem [resolvable:$true] %s45_s8 }
   0xb   :  { %51 = dma.hbm_to_vmem [thread:$0]  %s44_s1, 256, %s46_s8, [#allocation6], %s458_s28, %s458_s28, %s459_s29  }
   0xc   :  { %448 = dma.done.wait [#allocation3], 256  }
   0xd   :  { %449 = vsyncadd [#allocation3], 4294967040 }
   0xe   :  { %450 = dma.done.wait [#allocation6], 288  }
   0xf   :  { %451 = vsyncadd [#allocation6], 4294967008  ;;  %v306_v0 = vld [vmem:[#allocation7 + $0x8] sm:$0xff]  ;;  %v305_v1 = vld [vmem:[#allocation7] sm:$0xff]  ;;  %vm102_vm0 = vcmask 261120   ;;  %v161_v29 = vlaneseq  ;;  %vm173_vm1 = vcmask 130112  }
  0x10   :  { %115 = vmatpush.bf16.msra.mxu0 %v306_v0  ;;  %309 = vmatpush.bf16.msra.mxu1 %v306_v0  ;;  %v307_v2 = vld [vmem:[#allocation2] sm:$0xff]  ;;  %v308_v3 = vld [vmem:[#allocation2 + $0x8] sm:$0xff]  ;;  %v79_v4 = vld [vmem:[#allocation5] sm:$0x3]  ;;  %vm178_vm2 = vcmask 1041409   ;;  %vm182_vm4 = vcmask 123904  }
  0x11   :  { %v129_v5 = vrot.slane %v79_v4, 1  ;;  %v130_v6 = vperm.slane %v79_v4, 0  ;;  %v323_v12 = vld [vmem:[%s529_s3] ss:$0 sm:$0xff]  ;;  %v162_v32 = vand.u32 127, %v161_v29  ;;  %v200_v50 = vshrl.u32 %v161_v29, 7 }
  0x12   :  { %s271_s10 = sshll.u32 %s531_s5, 4  ;;  %s461_s11 = smov [#allocation9]   ;;  %v77_v57 = vld [vmem:[#allocation2 + $0x8] sm:$0xff]   ;;  %v76_v0 = vld [vmem:[#allocation2] sm:$0xff]   ;;  %vm250_vm5 = vcmask 254976   ;;  %s272_s10 = int_to_ptr.hbm [resolvable:$true] %s271_s10 }
  0x13   :  { %v131_v7 = vperm.slane %v129_v5, 0  ;;  %v171_v33 = vadd.s32 4294967288, %v162_v32  ;;  %vm163_vm3 = vcmp.lt.s32.totalorder %v162_v32, 12  ;;  %320 = vset.pattern.permute.xlu2 %v200_v50  ;;  %318 = vset.pattern.permute.xlu0 %v200_v50  ;;  %v207_v51 = vadd.s32 8, %v200_v50  ;;  %s269_s12 = sshll.u32 %s461_s11, 4  ;;  %s462_s5 = smov [#allocation8]   ;;  %s270_s12 = int_to_ptr.vmem [resolvable:$true] %s269_s12 }
  0x14   :  { %116 = vmatpush.bf16.msra.mxu0 %v305_v1  ;;  %310 = vmatpush.bf16.msra.mxu1 %v305_v1  ;;  %v196_v59 = vunpack.c.l.bf16 %v77_v57  ;;  %v197_v60 = vunpack.c.h.bf16 %v77_v57  ;;  %v195_v4 = vunpack.c.h.bf16 %v76_v0  ;;  %s258_s13 = sshll.u32 %s462_s5, 4  ;;  %s260_s16 = sshll.u32 %s530_s4, 4  ;;  %s259_s13 = int_to_ptr.vmem [resolvable:$true] %s258_s13  ;;  %s261_s16 = int_to_ptr.hbm [resolvable:$true] %s260_s16 }
  0x15   :  { %319 = vset.pattern.permute.xlu1 %v207_v51 }
  0x17   :  { %303 = vmatmul.msk.bf16.vlgmr.msra.gmra.mxu0 %vm102_vm0, %v307_v2  ;;  %304 = vmatmul.msk.bf16.vlgmr.msra.gmra.mxu1 %vm102_vm0, %v308_v3 }
  0x94   :  { %v118_v8 = vpop.f32.mrf.mxu0  ;;  %v123_v9 = vpop.f32.mrf.mxu1 }
  0x95   :  { %v134_v10 = vadd.f32 %v130_v6, %v118_v8  ;;  %v136_v11 = vadd.f32 %v131_v7, %v123_v9 }
  0x97   :  { %v138_v13 = vmax.f32 %v134_v10, 0.0  ;;  %v140_v14 = vmax.f32 %v136_v11, 0.0 }
  0x99   :  { %v147_v15 = vmul.f32 %v323_v12, %v140_v14  ;;  %v145_v16 = vmul.f32 %v323_v12, %v138_v13 }
  0x9b   :  { %v155_v17 = vsel %vm102_vm0, %v147_v15, 0.0  ;;  %v149_v18 = vsel %vm102_vm0, %v145_v16, 0.0 }
  0x9c   :  { %156 = vadd.xlane.f32.xlu1 %v155_v17  ;;  %v125_v19 = vpop.f32.mrf.mxu1  ;;  %150 = vadd.xlane.f32.xlu0 %v149_v18  ;;  %v120_v20 = vpop.f32.mrf.mxu0 }
  0x9d   :  { %v137_v21 = vadd.f32 %v131_v7, %v125_v19  ;;  %v135_v22 = vadd.f32 %v130_v6, %v120_v20  ;;  %v194_v6 = vunpack.c.l.bf16 %v76_v0 }
  0x9f   :  { %v141_v23 = vmax.f32 %v137_v21, 0.0  ;;  %v139_v24 = vmax.f32 %v135_v22, 0.0 }
  0xa1   :  { %v148_v25 = vmul.f32 %v323_v12, %v141_v23  ;;  %v146_v26 = vmul.f32 %v323_v12, %v139_v24 }
  0xa3   :  { %v158_v27 = vsel %vm102_vm0, %v148_v25, 0.0  ;;  %v152_v28 = vsel %vm102_vm0, %v146_v26, 0.0 }
  0xa4   :  { %159 = vadd.xlane.f32.xlu1 %v158_v27  ;;  %153 = vadd.xlane.f32.xlu0 %v152_v28 }
 0x10f   :  { %v157_v30 = vpop.xlane.xlu1 %156  ;;  %v151_v31 = vpop.xlane.xlu0 %150 }
 0x110   :  { %v175_v36 = vperm.slane %v157_v30, %v162_v32  ;;  %v170_v37 = vperm.slane %v151_v31, %v162_v32 }
 0x117   :  { %v160_v34 = vpop.xlane.xlu1 %159  ;;  %v154_v35 = vpop.xlane.xlu0 %153 }
 0x118   :  { %v176_v38 = vperm.slane %v160_v34, %v171_v33  ;;  %v172_v39 = vperm.slane %v154_v35, %v171_v33 }
 0x11a   :  { %v174_v40 = vsel %vm173_vm1, %v172_v39, %v170_v37  ;;  %v177_v41 = vsel %vm173_vm1, %v176_v38, %v175_v36 }
 0x11b   :  { %v179_v42 = vsel %vm178_vm2, %v177_v41, %v174_v40 }
 0x11c   :  { %v181_v43 = vsel %vm163_vm3, %v179_v42, -1e+30 }
 0x11d   :  { %v183_v44 = vsel %vm182_vm4, %v181_v43, -inf }
 0x11e   :  { %184 = vmax.xlane.f32.xlu2 %v183_v44 }
 0x191   :  { %v185_v45 = vpop.xlane.xlu2 %184 }
 0x192   :  { %v186_v46 = vsub.f32 %v181_v43, %v185_v45 }
 0x194   :  { %v187_v47 = vmul.f32 1.442695, %v186_v46 }
 0x196   :  { %324 = vpow2.f32 %v187_v47 }
 0x19c   :  { %v325_v48 = vpop.eup %324 }
 0x19d   :  { %v189_v49 = vsel %vm182_vm4, %v325_v48, 0.0 }
 0x19e   :  { %190 = vadd.xlane.f32.xlu2 %v189_v49 }
 0x211   :  { %v191_v52 = vpop.xlane.xlu2 %190 }
 0x212   :  { %326 = vrcp.f32 %v191_v52 }
 0x218   :  { %v327_v53 = vpop.eup %326 }
 0x219   :  { %v193_v54 = vmul.f32 %v327_v53, %v325_v48 }
 0x21b   :  { %252 = vst.msk [vmem:[#allocation9] sm:$0x3] %vm182_vm4, %v193_v54  ;;  %v211_v55 = vperm.slane %v193_v54, 1  ;;  %v198_v56 = vperm.slane %v193_v54, 0 }
 0x21c   :  { %274 = dma.vmem_to_hbm [thread:$0]  %s270_s12, 32, %s272_s10, [#allocation10]  }
 0x21d   :  { %216 = vperm.xlu2 %320, %v211_v55   ;;  %209 = vperm.xlu1 %319, %v198_v56  }
 0x21e   :  { %203 = vperm.xlu0 %318, %v198_v56  }
 0x225   :  { %321 = vset.pattern.permute.xlu2 %v207_v51 }
 0x226   :  { %322 = vset.pattern.permute.xlu0 %v207_v51 }
 0x22d   :  { %222 = vperm.xlu2 %321, %v211_v55  }
 0x277   :  { %v217_v58 = vpop.permute.xlu2 %216 }
 0x278   :  { %v226_v61 = vmul.f32 %v217_v58, %v196_v59 }
 0x27a   :  { %v237_v1 = vsel %vm102_vm0, %v226_v61, 0.0 }
 0x287   :  { %v223_v62 = vpop.permute.xlu2 %222 }
 0x288   :  { %v227_v63 = vmul.f32 %v223_v62, %v197_v60 }
 0x28a   :  { %v238_v2 = vsel %vm102_vm0, %v227_v63, 0.0 }
 0x28b   :  { %v239_v3 = vadd.f32 %v238_v2, %v237_v1 }
 0x28d   :  { %v240_v5 = vrot.slane %v239_v3, 4 }
 0x28f   :  { %v210_v7 = vpop.permute.xlu1 %209  ;;  %v241_v8 = vadd.f32 %v240_v5, %v239_v3 }
 0x290   :  { %v225_v9 = vmul.f32 %v210_v7, %v195_v4  ;;  %v204_v10 = vpop.permute.xlu0 %203 }
 0x291   :  { %v224_v11 = vmul.f32 %v204_v10, %v194_v6  ;;  %v242_v14 = vrot.slane %v241_v8, 2 }
 0x292   :  { %v229_v12 = vsel %vm102_vm0, %v225_v9, 0.0 }
 0x293   :  { %v228_v13 = vsel %vm102_vm0, %v224_v11, 0.0  ;;  %v243_v17 = vadd.f32 %v242_v14, %v241_v8 }
 0x294   :  { %v230_v15 = vadd.f32 %v229_v12, %v228_v13 }
 0x295   :  { %v244_v20 = vrot.slane %v243_v17, 1 }
 0x296   :  { %v231_v16 = vrot.slane %v230_v15, 4 }
 0x297   :  { %v245_v23 = vadd.f32 %v244_v20, %v243_v17 }
 0x298   :  { %v232_v18 = vadd.f32 %v231_v16, %v230_v15 }
 0x29a   :  { %v233_v19 = vrot.slane %v232_v18, 2 }
 0x29c   :  { %v234_v21 = vadd.f32 %v233_v19, %v232_v18 }
 0x29e   :  { %v235_v22 = vrot.slane %v234_v21, 1 }
 0x2a0   :  { %v236_v24 = vadd.f32 %v235_v22, %v234_v21 }
 0x2a2   :  { %v248_v25 = vsel %vm178_vm2, %v245_v23, %v236_v24 }
 0x2a3   :  { %251 = vst.msk [vmem:[#allocation8] sm:$0x3] %vm250_vm5, %v248_v25 }
 0x2a4   :  { %263 = dma.vmem_to_hbm [thread:$0]  %s259_s13, 32, %s261_s16, [#allocation4]  }
 0x2a5   :  { %452 = dma.done.wait [#allocation4], 32  }
 0x2a6   :  { %453 = vsyncadd [#allocation4], 4294967264 }
 0x2a7   :  { %454 = dma.done.wait [#allocation10], 32  }
 0x2a8   :  { %455 = vsyncadd [#allocation10], 4294967264 }
 0x2a9   :  { %283 = vsyncpa [#allocation3], 1 }
 0x2aa   :  { %284 = vsyncpa [#allocation6], 1 }
 0x2ab   :  { %285 = vsyncpa [#allocation4], 1 }
 0x2ac   :  { %286 = vsyncpa [#allocation10], 1 }

</bundles_post_ra>
